<compile_context>
chip_gen: v7x
topology: tpu7x:2x2x1
jax: 0.10.0
libtpu: 0.0.40
codegen_flags: <defaults>
</compile_context>

<pallas_src>
import jax
import jax.numpy as jnp
from jax.experimental import pallas as pl
from jax.experimental.pallas import tpu as pltpu


# -----------------------------------------------------------------------------
# Single fused Pallas kernel: pooler + image pool/projection + fusion head
# -----------------------------------------------------------------------------
def _fused_forward_kernel(pooled_c_ref, pooled_r_ref, images_ref,
                          w_pool_ref, b_pool_ref,
                          wc_m_ref, w_img_m_ref, b_all_ref,
                          prob_ref):
    """Inputs (all resident in VMEM, single grid point):
         pooled_c_ref : [B, H]       masked-mean-pooled context embeddings
         pooled_r_ref : [B, H]       masked-mean-pooled response embeddings
         images_ref   : [B, C, P]    NCHW image features with spatial flattened
                                     (P = IMG*IMG, lane-aligned multiple of 128)
         w_pool_ref   : [H, H], b_pool_ref : [1, H]   (shared text pooler)
         wc_m_ref     : [H, H]  = w_fc[:H] @ M                       (folded)
         w_img_m_ref  : [C, H]  = w_img @ (w_fc[H:] @ M)             (folded)
         b_all_ref    : [1, H]  = b_fc @ M + b_img @ (w_fc[H:] @ M)  (folded)
       Output:
         prob_ref     : [B, 1]  sigmoid(bmm(ci, r))
    """
    # 1) Shared-weight text pooler for contexts and responses (tanh on EUP).
    c = jnp.tanh(
        jnp.dot(pooled_c_ref[...], w_pool_ref[...],
                preferred_element_type=jnp.float32)
        + b_pool_ref[...])                                           # [B, H]
    r = jnp.tanh(
        jnp.dot(pooled_r_ref[...], w_pool_ref[...],
                preferred_element_type=jnp.float32)
        + b_pool_ref[...])                                           # [B, H]

    # 2) Image global-average pool over the (lane-aligned) spatial axis.
    img = jnp.mean(images_ref[...], axis=-1)                         # [B, C]

    # 3) Fusion head, 'concat' method with BOTH the image projection and M
    #    folded into the weights:
    #      ci = (concat(c, img_proj) @ w_fc + b_fc) @ M
    #         =  c @ (Wc@M) + img @ (w_img @ (Wi@M)) + (b_fc@M + b_img@(Wi@M))
    ci = (jnp.dot(c, wc_m_ref[...], preferred_element_type=jnp.float32)
          + jnp.dot(img, w_img_m_ref[...], preferred_element_type=jnp.float32)
          + b_all_ref[...])                                          # [B, H]

    # 4) Row-wise bmm score + sigmoid.
    # TODO(synk): at large B, emit scores lane-dense (e.g. [1, pad(B,128)])
    # instead of a width-1 column to avoid masked vst.msk stores.
    score = jnp.sum(ci * r, axis=1, keepdims=True)                   # [B, 1]
    prob_ref[...] = jax.nn.sigmoid(score)


def fused_forward(pooled_c, pooled_r, images_flat, fp):
    B = pooled_c.shape[0]
    # Single grid point: at these shapes the kernel is overhead-bound.
    # TODO(synk): at production batch sizes add a batch grid
    # (grid=(pl.cdiv(B, TB),), dimension_semantics=("parallel",)) so v7x's two
    # TensorCores both get work; weights keep constant index_maps.
    return pl.pallas_call(
        _fused_forward_kernel,
        out_shape=jax.ShapeDtypeStruct((B, 1), jnp.float32),
        in_specs=[pl.BlockSpec(memory_space=pltpu.MemorySpace.VMEM)] * 8,
        out_specs=pl.BlockSpec(memory_space=pltpu.MemorySpace.VMEM),
    )(pooled_c, pooled_r, images_flat,
      fp["w_pool"], fp["b_pool"],
      fp["wc_m"], fp["w_img_m"], fp["b_all"])


# -----------------------------------------------------------------------------
# One-time parameter preparation (fold M + image projection) — done at load time
# -----------------------------------------------------------------------------
def prepare_fused_params(params):
    H = params["M"].shape[0]
    wc = params["w_fc"][:H, :]            # applied to contexts_first
    wi = params["w_fc"][H:, :]            # applied to images_feature
    wi_m = wi @ params["M"]               # [H, H] (intermediate, not shipped)
    w_img_m = params["w_img"] @ wi_m      # [C, H]  image proj folded through fc & M
    b_all = params["b_fc"] @ params["M"] + params["b_img"] @ wi_m    # [H]
    return {
        "w_pool":  params["w_pool"],
        "b_pool":  params["b_pool"].reshape(1, -1),
        "wc_m":    wc @ params["M"],
        "w_img_m": w_img_m,
        "b_all":   b_all.reshape(1, -1),
    }


# -----------------------------------------------------------------------------
# Simplified sub-encoder front-ends (external modules in the original repo)
# -----------------------------------------------------------------------------
# TODO(synk): model.bert.BertEncoder (full transformer stack) is not available;
# approximated as masked mean-pooled token embeddings; the pooler dense + tanh
# runs inside the fused Pallas kernel.
def masked_mean_pool(emb_table, tokens, mask):
    emb = emb_table[tokens]                                  # [B, S, H] (XLA gather)
    m = mask.astype(jnp.float32)[..., None]                  # [B, S, 1]
    return jnp.sum(emb * m, axis=1) / jnp.maximum(jnp.sum(m, axis=1), 1.0)


# TODO(synk): model.vgg.VggEncoder conv backbone is not available; approximated
# as a global average pool over NCHW spatial dims (done in-kernel) followed by a
# dense projection (folded into the fused fusion weights).
# TODO(synk): at a real BERT vocab the embedding gather would move in-kernel via
# a DMA gather (pl.ANY + make_async_copy); kept in XLA at this toy vocab size.


# -----------------------------------------------------------------------------
# Full forward (one pallas_call on the hot path)
# -----------------------------------------------------------------------------
@jax.jit
def text_image_bert_encoder_forward(fused_params, emb_table,
                                    contexts, cm, images, responses, rm):
    pooled_c = masked_mean_pool(emb_table, contexts, cm)      # [B, H]
    pooled_r = masked_mean_pool(emb_table, responses, rm)     # [B, H]
    B, C, Hs, Ws = images.shape
    images_flat = images.reshape(B, C, Hs * Ws)               # free (bitcast)
    return fused_forward(pooled_c, pooled_r, images_flat, fused_params)  # [B, 1]


# -----------------------------------------------------------------------------
# Pure-JAX reference (matches the PyTorch module's concat path, nothing folded)
# -----------------------------------------------------------------------------
def _reference(params, contexts, cm, images, responses, rm):
    def tenc(tok, m):
        emb = params["emb"][tok]
        mm = m.astype(jnp.float32)[..., None]
        pooled = jnp.sum(emb * mm, axis=1) / jnp.maximum(jnp.sum(mm, axis=1), 1.0)
        return jnp.tanh(pooled @ params["w_pool"] + params["b_pool"])

    c = tenc(contexts, cm)
    r = tenc(responses, rm)
    img = jnp.mean(images, axis=(2, 3)) @ params["w_img"] + params["b_img"]
    fused = jnp.concatenate([c, img], axis=1) @ params["w_fc"] + params["b_fc"]
    ci = fused @ params["M"]
    score = jnp.sum(ci * r, axis=1, keepdims=True)
    return jax.nn.sigmoid(score)


# -----------------------------------------------------------------------------
# Main
# -----------------------------------------------------------------------------
if __name__ == "__main__":
    B = 8          # batch (multiple of 8 -> f32 sublane-tile aligned)
    S = 8          # sequence length
    H = 128        # config.hidden_size
    C, IMG = 4, 16 # image channels / spatial (NCHW); IMG*IMG = 256 lane-aligned
    VOCAB = 32

    key = jax.random.PRNGKey(0)
    keys = jax.random.split(key, 12)

    def xavier(k, shape):
        fan_in, fan_out = shape[0], shape[1]
        std = (2.0 / (fan_in + fan_out)) ** 0.5
        return std * jax.random.normal(k, shape, dtype=jnp.float32)

    params = {
        "emb":    0.02 * jax.random.normal(keys[0], (VOCAB, H), dtype=jnp.float32),
        "w_pool": xavier(keys[1], (H, H)),
        "b_pool": jnp.zeros((H,), dtype=jnp.float32),
        "w_img":  xavier(keys[2], (C, H)),
        "b_img":  jnp.zeros((H,), dtype=jnp.float32),
        # nn.Linear(2H, H): stored here as [in=2H, out=H]
        "w_fc":   xavier(keys[3], (2 * H, H)),
        "b_fc":   0.01 * jax.random.normal(keys[4], (H,), dtype=jnp.float32),
        # M initialised with xavier_normal_ as in the module
        "M":      xavier(keys[5], (H, H)),
    }

    contexts = jax.random.randint(keys[6], (B, S), 0, VOCAB, dtype=jnp.int32)
    responses = jax.random.randint(keys[7], (B, S), 0, VOCAB, dtype=jnp.int32)
    cm = (jax.random.uniform(keys[8], (B, S)) > 0.2).astype(jnp.float32)
    rm = (jax.random.uniform(keys[9], (B, S)) > 0.2).astype(jnp.float32)
    images = jax.random.normal(keys[10], (B, C, IMG, IMG), dtype=jnp.float32)

    # One-time param prep (fold M and the image projection into the fusion head).
    fused_params = prepare_fused_params(params)
    fused_params = jax.tree_util.tree_map(jax.block_until_ready, fused_params)

    prob = text_image_bert_encoder_forward(fused_params, params["emb"],
                                           contexts, cm, images, responses, rm)
    prob = jax.block_until_ready(prob)

    ref = _reference(params, contexts, cm, images, responses, rm)
    assert prob.shape == (B, 1)
    assert jnp.allclose(prob, ref, atol=1e-5, rtol=1e-5), "mismatch vs reference"

    print("KERNEL_OK")
</pallas_src>

<mosaic_0001>
module attributes {stable_mosaic.version = 11 : i64} {
  func.func @_fused_forward_kernel(%arg0: memref<8x128xf32, #tpu.memory_space<vmem>>, %arg1: memref<8x128xf32, #tpu.memory_space<vmem>>, %arg2: memref<8x4x256xf32, #tpu.memory_space<vmem>>, %arg3: memref<128x128xf32, #tpu.memory_space<vmem>>, %arg4: memref<1x128xf32, #tpu.memory_space<vmem>>, %arg5: memref<128x128xf32, #tpu.memory_space<vmem>>, %arg6: memref<4x128xf32, #tpu.memory_space<vmem>>, %arg7: memref<1x128xf32, #tpu.memory_space<vmem>>, %arg8: memref<8x1xf32, #tpu.memory_space<vmem>>) attributes {dimension_semantics = [], scalar_prefetch = 0 : i64, scratch_operands = 0 : i64, tpu.core_type = #tpu.core_type<tc>} {
    %c0 = arith.constant 0 : index
    %c0_0 = arith.constant 0 : index
    %0 = vector.load %arg0[%c0, %c0_0] : memref<8x128xf32, #tpu.memory_space<vmem>>, vector<8x128xf32>
    %c0_1 = arith.constant 0 : index
    %c0_2 = arith.constant 0 : index
    %1 = vector.load %arg3[%c0_1, %c0_2] : memref<128x128xf32, #tpu.memory_space<vmem>>, vector<128x128xf32>
    %cst = arith.constant dense<0.000000e+00> : vector<8x128xf32>
    %2 = tpu.matmul %0, %1, %cst {dimension_numbers = #tpu.dot_dimension_numbers<[1], [0], [0], [1], [0, 0, 1, 1], [], []>} : vector<8x128xf32>, vector<128x128xf32>, vector<8x128xf32> -> vector<8x128xf32>
    %c0_3 = arith.constant 0 : index
    %c0_4 = arith.constant 0 : index
    %3 = vector.load %arg4[%c0_3, %c0_4] : memref<1x128xf32, #tpu.memory_space<vmem>>, vector<1x128xf32>
    %4 = vector.broadcast %3 : vector<1x128xf32> to vector<8x128xf32>
    %5 = arith.addf %2, %4 : vector<8x128xf32>
    %6 = math.tanh %5 : vector<8x128xf32>
    %c0_5 = arith.constant 0 : index
    %c0_6 = arith.constant 0 : index
    %7 = vector.load %arg1[%c0_5, %c0_6] : memref<8x128xf32, #tpu.memory_space<vmem>>, vector<8x128xf32>
    %c0_7 = arith.constant 0 : index
    %c0_8 = arith.constant 0 : index
    %8 = vector.load %arg3[%c0_7, %c0_8] : memref<128x128xf32, #tpu.memory_space<vmem>>, vector<128x128xf32>
    %cst_9 = arith.constant dense<0.000000e+00> : vector<8x128xf32>
    %9 = tpu.matmul %7, %8, %cst_9 {dimension_numbers = #tpu.dot_dimension_numbers<[1], [0], [0], [1], [0, 0, 1, 1], [], []>} : vector<8x128xf32>, vector<128x128xf32>, vector<8x128xf32> -> vector<8x128xf32>
    %c0_10 = arith.constant 0 : index
    %c0_11 = arith.constant 0 : index
    %10 = vector.load %arg4[%c0_10, %c0_11] : memref<1x128xf32, #tpu.memory_space<vmem>>, vector<1x128xf32>
    %11 = vector.broadcast %10 : vector<1x128xf32> to vector<8x128xf32>
    %12 = arith.addf %9, %11 : vector<8x128xf32>
    %13 = math.tanh %12 : vector<8x128xf32>
    %c0_12 = arith.constant 0 : index
    %c0_13 = arith.constant 0 : index
    %c0_14 = arith.constant 0 : index
    %14 = vector.load %arg2[%c0_12, %c0_13, %c0_14] : memref<8x4x256xf32, #tpu.memory_space<vmem>>, vector<8x4x256xf32>
    %cst_15 = arith.constant dense<0.000000e+00> : vector<8x4xf32>
    %15 = vector.multi_reduction <add>, %14, %cst_15 [2] : vector<8x4x256xf32> to vector<8x4xf32>
    %cst_16 = arith.constant 2.560000e+02 : f32
    %16 = vector.broadcast %cst_16 : f32 to vector<8x4xf32>
    %17 = arith.divf %15, %16 : vector<8x4xf32>
    %c0_17 = arith.constant 0 : index
    %c0_18 = arith.constant 0 : index
    %18 = vector.load %arg5[%c0_17, %c0_18] : memref<128x128xf32, #tpu.memory_space<vmem>>, vector<128x128xf32>
    %cst_19 = arith.constant dense<0.000000e+00> : vector<8x128xf32>
    %19 = tpu.matmul %6, %18, %cst_19 {dimension_numbers = #tpu.dot_dimension_numbers<[1], [0], [0], [1], [0, 0, 1, 1], [], []>} : vector<8x128xf32>, vector<128x128xf32>, vector<8x128xf32> -> vector<8x128xf32>
    %c0_20 = arith.constant 0 : index
    %c0_21 = arith.constant 0 : index
    %20 = vector.load %arg6[%c0_20, %c0_21] : memref<4x128xf32, #tpu.memory_space<vmem>>, vector<4x128xf32>
    %cst_22 = arith.constant dense<0.000000e+00> : vector<8x128xf32>
    %21 = tpu.matmul %17, %20, %cst_22 {dimension_numbers = #tpu.dot_dimension_numbers<[1], [0], [0], [1], [0, 0, 1, 1], [], []>} : vector<8x4xf32>, vector<4x128xf32>, vector<8x128xf32> -> vector<8x128xf32>
    %22 = arith.addf %19, %21 : vector<8x128xf32>
    %c0_23 = arith.constant 0 : index
    %c0_24 = arith.constant 0 : index
    %23 = vector.load %arg7[%c0_23, %c0_24] : memref<1x128xf32, #tpu.memory_space<vmem>>, vector<1x128xf32>
    %24 = vector.broadcast %23 : vector<1x128xf32> to vector<8x128xf32>
    %25 = arith.addf %22, %24 : vector<8x128xf32>
    %26 = arith.mulf %25, %13 : vector<8x128xf32>
    %cst_25 = arith.constant dense<0.000000e+00> : vector<8xf32>
    %27 = vector.multi_reduction <add>, %26, %cst_25 [1] : vector<8x128xf32> to vector<8xf32>
    %28 = vector.shape_cast %27 : vector<8xf32> to vector<8x1xf32>
    %29 = arith.negf %28 : vector<8x1xf32>
    %30 = math.exp %29 : vector<8x1xf32>
    %cst_26 = arith.constant 1.000000e+00 : f32
    %31 = vector.broadcast %cst_26 : f32 to vector<8x1xf32>
    %32 = arith.addf %31, %30 : vector<8x1xf32>
    %33 = arith.divf %31, %32 : vector<8x1xf32>
    %c0_27 = arith.constant 0 : index
    %c0_28 = arith.constant 0 : index
    %34 = vector.load %arg8[%c0_27, %c0_28] : memref<8x1xf32, #tpu.memory_space<vmem>>, vector<8x1xf32>
    tpu.vector_store %arg8[%c0_27, %c0_28], %33 {strides = array<i32>} : memref<8x1xf32, #tpu.memory_space<vmem>>, vector<8x1xf32>,
    return
  }
}

</mosaic_0001>

<bundles_post_ra>
// kernel: text_image_bert_encoder_forward.1
= control target key start
LH: loop header
LB: loop body
LE: loop exit
PB: predicated region body
PF: predicated region fallthrough
CT: control target
= control target key end

     0   :  { %v779_v0 = vmov 0.0|0.0   ;;  %vm780_vm0 = vmmov 0   ;;  %v781_v4 = vmov 0.0   ;;  %vm228_vm1 = vcmask 1043456   ;;  %s1015_s3 = inlined_call_operand.vmem [shape: f32[128,128], index: 3, kind: input, shape index: {}]   ;;  %s1016_s2 = inlined_call_operand.vmem [shape: f32[8,4,256], index: 2, kind: input, shape index: {}]   ;;  %s1017_s5 = inlined_call_operand.vmem [shape: f32[128,128], index: 5, kind: input, shape index: {}]   ;;  %s1018_s0 = inlined_call_operand.vmem [shape: f32[8,128], index: 0, kind: input, shape index: {}]   ;;  %s1019_s1 = inlined_call_operand.vmem [shape: f32[8,128], index: 1, kind: input, shape index: {}]   ;;  %s1020_s6 = inlined_call_operand.vmem [shape: f32[4,128], index: 6, kind: input, shape index: {}]   ;;  %s1021_s4 = inlined_call_operand.vmem [shape: f32[1,128], index: 4, kind: input, shape index: {}]   ;;  %s1022_s7 = inlined_call_operand.vmem [shape: f32[1,128], index: 7, kind: input, shape index: {}]   ;;  %s1023_s8 = inlined_call_operand.vmem [shape: f32[8,1], index: 8, kind: output, shape index: {}]  }
   0x1   :  { %688 = vmatprep.subr.bf16.mxu0 %v779_v0  ;;  %v30_v1 = vld [vmem:[%s1015_s3] sm:$0xff]  ;;  %v31_v2 = vld [vmem:[%s1015_s3 + $0x8] sm:$0xff]  ;;  %v32_v3 = vld [vmem:[%s1015_s3 + $0x10] sm:$0xff]  ;;  %610 = vmatprep.mubr.msk.f32.mxu0 %vm780_vm0, %v781_v4  ;;  %vm337_vm2 = vcmask 1041409   ;;  %vm339_vm3 = vcmask 1042434   ;;  %vm341_vm4 = vcmask 1043459  }
   0x2   :  { %v689_v5 = vpack.c.bf16 %v31_v2, %v30_v1  ;;  %v33_v6 = vld [vmem:[%s1015_s3 + $0x18] sm:$0xff]  ;;  %712 = vmatprep.subr.bf16.mxu1 %v779_v0  ;;  %645 = vmatprep.mubr.msk.f32.mxu1 %vm780_vm0, %v781_v4  ;;  %v34_v8 = vld [vmem:[%s1015_s3 + $0x20] sm:$0xff]  ;;  %v35_v9 = vld [vmem:[%s1015_s3 + $0x28] sm:$0xff]  ;;  %vm343_vm5 = vcmask 1044484   ;;  %vm345_vm6 = vcmask 1045509   ;;  %vm347_vm7 = vcmask 1046534  }
   0x3   :  { %v692_v7 = vpack.c.bf16 %v33_v6, %v32_v3  ;;  %v196_v10 = vld [vmem:[%s1016_s2] sm:$0xff]  ;;  %v198_v13 = vld [vmem:[%s1016_s2 + $0x10] sm:$0xff]  ;;  %v197_v14 = vld [vmem:[%s1016_s2 + $0x8] sm:$0xff]  ;;  %v695_v16 = vpack.c.bf16 %v35_v9, %v34_v8  ;;  %vm349_vm8 = vcmask 1047559   ;;  %vm351_vm9 = vcmask 31744  }
   0x4   :  { %690 = vmatpush3.bf16.msra.mxu0 %v689_v5  ;;  %714 = vmatpush3.bf16.msra.mxu1 %v689_v5  ;;  %v212_v11 = vcombine.high %v196_v10, %v196_v10  ;;  %v229_v12 = vsel %vm228_vm1, %v196_v10, 0.0  ;;  %v199_v15 = vld [vmem:[%s1016_s2 + $0x18] sm:$0xff]  ;;  %v214_v17 = vcombine.high %v198_v13, %v198_v13  ;;  %v239_v18 = vsel %vm228_vm1, %v198_v13, 0.0  ;;  %v200_v20 = vld [vmem:[%s1016_s2 + $0x20] sm:$0xff]  ;;  %v36_v21 = vld [vmem:[%s1015_s3 + $0x30] sm:$0xff] }
   0x5   :  { %691 = vmatprep.subr.bf16.mxu0 %v779_v0  ;;  %715 = vmatprep.subr.bf16.mxu1 %v779_v0  ;;  %v213_v19 = vcombine.high %v197_v14, %v197_v14  ;;  %v37_v22 = vld [vmem:[%s1015_s3 + $0x38] sm:$0xff]  ;;  %v234_v24 = vsel %vm228_vm1, %v197_v14, 0.0  ;;  %v215_v25 = vcombine.high %v199_v15, %v199_v15  ;;  %v216_v26 = vcombine.high %v200_v20, %v200_v20  ;;  %v201_v27 = vld [vmem:[%s1016_s2 + $0x28] sm:$0xff]  ;;  %v202_v32 = vld [vmem:[%s1016_s2 + $0x30] sm:$0xff] }
   0x6   :  { %v230_v23 = vsel %vm228_vm1, %v212_v11, 0.0  ;;  %v240_v29 = vsel %vm228_vm1, %v214_v17, 0.0  ;;  %v244_v31 = vsel %vm228_vm1, %v199_v15, 0.0  ;;  %v203_v35 = vld [vmem:[%s1016_s2 + $0x38] sm:$0xff]  ;;  %v698_v36 = vpack.c.bf16 %v37_v22, %v36_v21  ;;  %v38_v39 = vld [vmem:[%s1015_s3 + $0x40] sm:$0xff]  ;;  %v39_v40 = vld [vmem:[%s1015_s3 + $0x48] sm:$0xff] }
   0x7   :  { %v231_v28 = vadd.f32 %v230_v23, %v229_v12  ;;  %v235_v30 = vsel %vm228_vm1, %v213_v19, 0.0  ;;  %v241_v33 = vadd.f32 %v240_v29, %v239_v18  ;;  %v245_v34 = vsel %vm228_vm1, %v215_v25, 0.0  ;;  %v40_v50 = vld [vmem:[%s1015_s3 + $0x50] sm:$0xff]  ;;  %v41_v51 = vld [vmem:[%s1015_s3 + $0x58] sm:$0xff]  ;;  %v42_v59 = vld [vmem:[%s1015_s3 + $0x60] sm:$0xff] }
   0x8   :  { %693 = vmatpush3.bf16.msra.mxu0 %v692_v7  ;;  %717 = vmatpush3.bf16.msra.mxu1 %v692_v7  ;;  %v236_v37 = vadd.f32 %v235_v30, %v234_v24  ;;  %v217_v38 = vcombine.high %v201_v27, %v201_v27  ;;  %v246_v41 = vadd.f32 %v245_v34, %v244_v31  ;;  %v249_v42 = vsel %vm228_vm1, %v200_v20, 0.0  ;;  %v43_v60 = vld [vmem:[%s1015_s3 + $0x68] sm:$0xff]  ;;  %v44_v63 = vld [vmem:[%s1015_s3 + $0x70] sm:$0xff]  ;;  %v45_v1 = vld [vmem:[%s1015_s3 + $0x78] sm:$0xff] }
   0x9   :  { %694 = vmatprep.subr.bf16.mxu0 %v779_v0  ;;  %718 = vmatprep.subr.bf16.mxu1 %v779_v0  ;;  %v250_v43 = vsel %vm228_vm1, %v216_v26, 0.0  ;;  %v218_v44 = vcombine.high %v202_v32, %v202_v32  ;;  %v254_v45 = vsel %vm228_vm1, %v201_v27, 0.0  ;;  %v219_v47 = vcombine.high %v203_v35, %v203_v35  ;;  %v278_v3 = vld [vmem:[%s1017_s5] sm:$0xff]  ;;  %v279_v5 = vld [vmem:[%s1017_s5 + $0x8] sm:$0xff]  ;;  %v280_v9 = vld [vmem:[%s1017_s5 + $0x10] sm:$0xff] }
   0xa   :  { %232 = vadd.xlane.f32.xlu0 %v231_v28  ;;  %242 = vadd.xlane.f32.xlu1 %v241_v33  ;;  %v255_v46 = vsel %vm228_vm1, %v217_v38, 0.0  ;;  %v701_v48 = vpack.c.bf16 %v39_v40, %v38_v39  ;;  %v251_v49 = vadd.f32 %v250_v43, %v249_v42  ;;  %v259_v53 = vsel %vm228_vm1, %v202_v32, 0.0  ;;  %v29_v6 = vld [vmem:[%s1018_s0] sm:$0xff]  ;;  %v281_v10 = vld [vmem:[%s1017_s5 + $0x18] sm:$0xff]  ;;  %v283_v13 = vld [vmem:[%s1017_s5 + $0x28] sm:$0xff] }
   0xb   :  { %v256_v52 = vadd.f32 %v255_v46, %v254_v45  ;;  %v260_v54 = vsel %vm228_vm1, %v218_v44, 0.0  ;;  %v264_v55 = vsel %vm228_vm1, %v203_v35, 0.0  ;;  %v265_v56 = vsel %vm228_vm1, %v219_v47, 0.0  ;;  %v124_v7 = vld [vmem:[%s1019_s1] sm:$0xff]  ;;  %v284_v15 = vld [vmem:[%s1017_s5 + $0x30] sm:$0xff]  ;;  %v287_v18 = vld [vmem:[%s1017_s5 + $0x48] sm:$0xff] }
   0xc   :  { %696 = vmatpush3.bf16.msra.mxu0 %v695_v16  ;;  %720 = vmatpush3.bf16.msra.mxu1 %v695_v16  ;;  %v704_v57 = vpack.c.bf16 %v41_v51, %v40_v50  ;;  %v261_v58 = vadd.f32 %v260_v54, %v259_v53  ;;  %v266_v61 = vadd.f32 %v265_v56, %v264_v55  ;;  %v282_v12 = vld [vmem:[%s1017_s5 + $0x20] sm:$0xff]  ;;  %v288_v20 = vld [vmem:[%s1017_s5 + $0x50] sm:$0xff]  ;;  %v289_v21 = vld [vmem:[%s1017_s5 + $0x58] sm:$0xff]  ;;  %v303_v30 = vlaneseq }
   0xd   :  { %697 = vmatprep.subr.bf16.mxu0 %v779_v0  ;;  %721 = vmatprep.subr.bf16.mxu1 %v779_v0  ;;  %v707_v62 = vpack.c.bf16 %v43_v60, %v42_v59  ;;  %v710_v2 = vpack.c.bf16 %v45_v1, %v44_v63  ;;  %v737_v8 = vpack.c.bf16 %v279_v5, %v278_v3  ;;  %v286_v17 = vld [vmem:[%s1017_s5 + $0x40] sm:$0xff]  ;;  %v291_v24 = vld [vmem:[%s1017_s5 + $0x68] sm:$0xff]  ;;  %v292_v27 = vld [vmem:[%s1017_s5 + $0x70] sm:$0xff]  ;;  %vm514_vm10 = vcmask 7168  }
   0xe   :  { %237 = vadd.xlane.f32.xlu0 %v236_v37  ;;  %247 = vadd.xlane.f32.xlu1 %v246_v41  ;;  %v740_v11 = vpack.c.bf16 %v281_v10, %v280_v9  ;;  %v743_v14 = vpack.c.bf16 %v283_v13, %v282_v12  ;;  %v749_v19 = vpack.c.bf16 %v287_v18, %v286_v17  ;;  %v290_v23 = vld [vmem:[%s1017_s5 + $0x60] sm:$0xff]  ;;  %v293_v28 = vld [vmem:[%s1017_s5 + $0x78] sm:$0xff]  ;;  %v304_v31 = vand.u32 127, %v303_v30 }
   0xf   :  { %v752_v22 = vpack.c.bf16 %v289_v21, %v288_v20  ;;  %v294_v25 = vld [vmem:[%s1020_s6] sm:$0xf]  ;;  %v755_v26 = vpack.c.bf16 %v291_v24, %v290_v23  ;;  %v758_v29 = vpack.c.bf16 %v293_v28, %v292_v27  ;;  %v306_v32 = vshrl.u32 %v303_v30, 7 }
  0x10   :  { %699 = vmatpush3.bf16.msra.mxu0 %v698_v36  ;;  %723 = vmatpush3.bf16.msra.mxu1 %v698_v36  ;;  %v520_v1 = vld [vmem:[%s1021_s4] ss:$0 sm:$0xff] }
  0x11   :  { %700 = vmatprep.subr.bf16.mxu0 %v779_v0  ;;  %724 = vmatprep.subr.bf16.mxu1 %v779_v0  ;;  %v307_v34 = vsub.s32 %v304_v31, %v306_v32  ;;  %v523_v13 = vld [vmem:[%s1022_s7] ss:$0 sm:$0xff] }
  0x12   :  { %252 = vadd.xlane.f32.xlu0 %v251_v49  ;;  %257 = vadd.xlane.f32.xlu1 %v256_v52 }
  0x14   :  { %702 = vmatpush3.bf16.msra.mxu0 %v701_v48  ;;  %726 = vmatpush3.bf16.msra.mxu1 %v701_v48 }
  0x15   :  { %703 = vmatprep.subr.bf16.mxu0 %v779_v0  ;;  %727 = vmatprep.subr.bf16.mxu1 %v779_v0 }
  0x16   :  { %262 = vadd.xlane.f32.xlu0 %v261_v58  ;;  %267 = vadd.xlane.f32.xlu1 %v266_v61 }
  0x18   :  { %705 = vmatpush3.bf16.msra.mxu0 %v704_v57  ;;  %729 = vmatpush3.bf16.msra.mxu1 %v704_v57 }
  0x19   :  { %706 = vmatprep.subr.bf16.mxu0 %v779_v0  ;;  %730 = vmatprep.subr.bf16.mxu1 %v779_v0 }
  0x1c   :  { %708 = vmatpush3.bf16.msra.mxu0 %v707_v62  ;;  %732 = vmatpush3.bf16.msra.mxu1 %v707_v62 }
  0x1d   :  { %709 = vmatprep.subr.bf16.mxu0 %v779_v0  ;;  %733 = vmatprep.subr.bf16.mxu1 %v779_v0 }
  0x20   :  { %711 = vmatpush3.bf16.msra.mxu0 %v710_v2  ;;  %735 = vmatpush3.bf16.msra.mxu1 %v710_v2 }
  0x21   :  { %648 = vmatprep.subr.mxu0 %v781_v4  ;;  %736 = vmatprep.subr.bf16.mxu1 %v779_v0 }
  0x23   :  { %611 = vmatmul.mubr.f32.vlgmr.msra.gmra.mrb[0].mxu0 %v29_v6  ;;  %646 = vmatmul.mubr.f32.vlgmr.msra.gmra.mrb[0].mxu1 %v124_v7 }
  0x24   :  { %650 = vmatprep.mubr.msk.f32.mxu0 %vm780_vm0, %v781_v4  ;;  %738 = vmatpush3.bf16.msra.mxu1 %v737_v8 }
  0x25   :  { %685 = vmatprep.mubr.msk.f32.mxu1 %vm780_vm0, %v781_v4  ;;  %739 = vmatprep.subr.bf16.mxu1 %v779_v0  ;;  %v285_v4 = vld [vmem:[%s1017_s5 + $0x38] sm:$0xff] }
  0x26   :  { %v746_v16 = vpack.c.bf16 %v285_v4, %v284_v15  ;;  %649 = vmatpush3.msk.msra.mxu0 %vm228_vm1, %v294_v25 }
  0x28   :  { %741 = vmatpush3.bf16.msra.mxu1 %v740_v11 }
  0x29   :  { %742 = vmatprep.subr.bf16.mxu1 %v779_v0 }
  0x2c   :  { %744 = vmatpush3.bf16.msra.mxu1 %v743_v14 }
  0x2d   :  { %745 = vmatprep.subr.bf16.mxu1 %v779_v0 }
  0x30   :  { %747 = vmatpush3.bf16.msra.mxu1 %v746_v16 }
  0x31   :  { %748 = vmatprep.subr.bf16.mxu1 %v779_v0 }
  0x34   :  { %750 = vmatpush3.bf16.msra.mxu1 %v749_v19 }
  0x35   :  { %751 = vmatprep.subr.bf16.mxu1 %v779_v0 }
  0x38   :  { %753 = vmatpush3.bf16.msra.mxu1 %v752_v22 }
  0x39   :  { %754 = vmatprep.subr.bf16.mxu1 %v779_v0 }
  0x3c   :  { %756 = vmatpush3.bf16.msra.mxu1 %v755_v26 }
  0x3d   :  { %757 = vmatprep.subr.bf16.mxu1 %v779_v0 }
  0x40   :  { %759 = vmatpush3.bf16.msra.mxu1 %v758_v29 }
  0x97   :  { %v233_v33 = vpop.xlane.xlu0 %232  ;;  %v243_v36 = vpop.xlane.xlu1 %242 }
  0x98   :  { %v270_v35 = vmul.f32 0.00390625, %v233_v33  ;;  %v272_v37 = vmul.f32 0.00390625, %v243_v36 }
  0x9a   :  { %v308_v39 = vrot.slane %v270_v35, %v307_v34  ;;  %v316_v42 = vrot.slane %v272_v37, %v307_v34 }
  0x9b   :  { %v238_v38 = vpop.xlane.xlu0 %237  ;;  %v248_v41 = vpop.xlane.xlu1 %247 }
  0x9c   :  { %v271_v40 = vmul.f32 0.00390625, %v238_v38  ;;  %v273_v43 = vmul.f32 0.00390625, %v248_v41 }
  0x9e   :  { %v312_v44 = vrot.slane %v271_v40, %v307_v34  ;;  %v320_v0 = vrot.slane %v273_v43, %v307_v34 }
  0x9f   :  { %v253_v45 = vpop.xlane.xlu0 %252  ;;  %v258_v48 = vpop.xlane.xlu1 %257 }
  0xa0   :  { %v338_v46 = vsel %vm337_vm2, %v312_v44, %v308_v39  ;;  %v274_v47 = vmul.f32 0.00390625, %v253_v45  ;;  %v275_v50 = vmul.f32 0.00390625, %v258_v48 }
  0xa1   :  { %v340_v49 = vsel %vm339_vm3, %v316_v42, %v338_v46 }
  0xa2   :  { %v342_v51 = vsel %vm341_vm4, %v320_v0, %v340_v49  ;;  %v324_v52 = vrot.slane %v274_v47, %v307_v34  ;;  %v328_v53 = vrot.slane %v275_v50, %v307_v34 }
  0xa3   :  { %v263_v54 = vpop.xlane.xlu0 %262  ;;  %v268_v57 = vpop.xlane.xlu1 %267 }
  0xa4   :  { %v344_v55 = vsel %vm343_vm5, %v324_v52, %v342_v51  ;;  %v276_v56 = vmul.f32 0.00390625, %v263_v54  ;;  %v277_v59 = vmul.f32 0.00390625, %v268_v57 }
  0xa5   :  { %v346_v58 = vsel %vm345_vm6, %v328_v53, %v344_v55 }
  0xa6   :  { %v332_v60 = vrot.slane %v276_v56, %v307_v34  ;;  %v336_v61 = vrot.slane %v277_v59, %v307_v34 }
  0xa8   :  { %v348_v62 = vsel %vm347_vm7, %v332_v60, %v346_v58 }
  0xa9   :  { %v350_v63 = vsel %vm349_vm8, %v336_v61, %v348_v62 }
  0xaa   :  { %651 = vmatmul.mubr.msk.f32.vlgmr.msra.gmra.mrb[2].mxu0 %vm351_vm9, %v350_v63 }
  0xf6   :  { %v119_v2 = vpop.f32.mrb[0].mxu0  ;;  %v191_v6 = vpop.f32.mrb[0].mxu1 }
  0xf7   :  { %v120_v3 = vadd.f32 %v520_v1, %v119_v2  ;;  %v612_v5 = vpop.f32.mrb[1].mxu0  ;;  %v192_v7 = vadd.f32 %v520_v1, %v191_v6  ;;  %v647_v8 = vpop.f32.mrb[1].mxu1 }
  0xf9   :  { %771 = vtanh.f32 %v120_v3 }
  0xfa   :  { %773 = vtanh.f32 %v192_v7 }
 0x103   :  { %v772_v9 = vpop.eup %771 }
 0x104   :  { %686 = vmatmul.mubr.f32.vlgmr.msra.gmra.mrb[2].mxu1 %v772_v9  ;;  %v774_v16 = vpop.eup %773 }
 0x17d   :  { %v423_v10 = vpop.f32.mrb[2].mxu0 }
 0x17e   :  { %v652_v11 = vpop.f32.mrb[3].mxu0 }
 0x1d7   :  { %v493_v12 = vpop.f32.mrb[2].mxu1 }
 0x1d8   :  { %v494_v14 = vadd.f32 %v493_v12, %v423_v10  ;;  %v687_v15 = vpop.f32.mrb[3].mxu1 }
 0x1da   :  { %v504_v4 = vadd.f32 %v523_v13, %v494_v14 }
 0x1dc   :  { %v505_v17 = vmul.f32 %v774_v16, %v504_v4 }
 0x1de   :  { %506 = vadd.xlane.f32.xlu0 %v505_v17 }
 0x26b   :  { %v507_v18 = vpop.xlane.xlu0 %506 }
 0x26c   :  { %v524_v19 = vmul.f32 -1.442695, %v507_v18 }
 0x26e   :  { %775 = vpow2.f32 %v524_v19 }
 0x278   :  { %v776_v20 = vpop.eup %775 }
 0x279   :  { %v511_v21 = vadd.f32 1.0, %v776_v20 }
 0x27b   :  { %777 = vrcp.f32 %v511_v21 }
 0x285   :  { %v778_v22 = vpop.eup %777 }
 0x286   :  { %515 = vst.msk [vmem:[%s1023_s8] sm:$0xff] %vm514_vm10, %v778_v22 }

</bundles_post_ra>
